<compile_context>
chip_gen: v7x
topology: tpu7x:2x2x1
jax: 0.10.0
libtpu: 0.0.40
codegen_flags: <defaults>
</compile_context>

<pallas_src>
import jax
import jax.numpy as jnp
from jax import lax
from jax.experimental import pallas as pl
from jax.experimental.pallas import tpu as pltpu


# ------------------------------ fused kernel ------------------------------- #

def _make_resblock_kernel(c_out, row_stride, l_pad):
    """Fused ResidualBlock kernel (channels on sublanes, spatial on lanes).

    p_ref  : (c_in*9, l_pad)  transposed im2col patches of the stride-2 conv,
             laid out on a zero-bordered (HO+2, WO+2) per-image grid flattened
             along lanes, zero-padded tail up to l_pad (lane-tile multiple).
    whr_ref: (2*c_out, c_in*9)  [ w_f1 ; w_ds∘w_res ] stacked row-wise.
    w2_ref : (9, c_out, c_out)  second-conv taps, indexed [k, o, c].
    o_ref  : (c_out, l_pad)     ReLU(f(x) + residual) on the bordered grid.
    """

    def kernel(p_ref, whr_ref, w2_ref, o_ref):
        # ONE MXU pass computes both the f-path first conv (rows :c_out) and
        # the folded residual path (rows c_out:), sharing the same patches.
        hr = jnp.dot(whr_ref[...], p_ref[...],
                     preferred_element_type=jnp.float32)        # (2*c_out, L)
        h = jnp.maximum(hr[:c_out, :], 0.0)   # ReLU(conv1(x)) -- computed once
        acc = hr[c_out:, :]                   # residual path

        # Second 3x3 conv (stride 1, pad 1) as 9 lane rotations of h.
        # Border columns of the grid hold ReLU(0 @ W) = 0, i.e. exactly the
        # zero padding this conv needs; roll wrap-around only pollutes border /
        # tail columns, which the wrapper discards.
        for k in range(9):
            kh, kw = k // 3, k % 3
            d = (kh - 1) * row_stride + (kw - 1)     # neighbor offset in lanes
            h_d = h if d == 0 else pltpu.roll(h, shift=(-d) % l_pad, axis=1)
            acc = acc + jnp.dot(w2_ref[k], h_d,
                                preferred_element_type=jnp.float32)

        # Final activation (residual already accumulated). Dense (8, 256) store.
        o_ref[...] = jnp.maximum(acc, 0.0)

    return kernel


# ------------------------------ XLA glue (jit) ----------------------------- #

def _im2col_T_s2_pad1(x_nchw, ho, wo, l_pad):
    """(N,C,H,W) -> (C*9, l_pad) transposed patch matrix of a 3x3 / stride-2 /
    pad-1 conv, on a zero-bordered (HO+2, WO+2) per-image grid flattened along
    the last (lane) axis, zero-padded to l_pad columns.
    Row order (c, kh, kw) matches w.reshape(c_out, c_in*9)."""
    n, c, _, _ = x_nchw.shape
    xp = jnp.pad(x_nchw, ((0, 0), (0, 0), (1, 1), (1, 1)))
    cols = [xp[:, :, kh:kh + 2 * ho:2, kw:kw + 2 * wo:2]
            for kh in range(3) for kw in range(3)]
    p = jnp.stack(cols, axis=2)                                # (N, C, 9, HO, WO)
    p = jnp.pad(p, ((0, 0), (0, 0), (0, 0), (1, 1), (1, 1)))   # zero border
    p = p.transpose(1, 2, 0, 3, 4).reshape(c * 9, n * (ho + 2) * (wo + 2))
    return jnp.pad(p, ((0, 0), (0, l_pad - p.shape[1])))       # zero tail


@jax.jit
def _resblock_forward(x, w_hr, w2_t):
    n, c_in, h, w = x.shape
    c_out = w2_t.shape[1]
    ho = (h + 2 - 3) // 2 + 1                     # stride-2, pad-1, k=3
    wo = (w + 2 - 3) // 2 + 1
    row_stride = wo + 2                           # +1 grid row, in lanes
    l_valid = n * (ho + 2) * (wo + 2)
    l_pad = ((l_valid + 127) // 128) * 128        # lane-tile aligned output

    # Single (transposed) im2col shared by f's first conv and the folded
    # residual conv; spatial positions live on the lane axis.
    p_t = _im2col_T_s2_pad1(x, ho, wo, l_pad)     # (c_in*9, l_pad)

    kernel = _make_resblock_kernel(c_out, row_stride, l_pad)
    vmem = pl.BlockSpec(memory_space=pltpu.MemorySpace.VMEM)
    out = pl.pallas_call(
        kernel,
        out_shape=jax.ShapeDtypeStruct((c_out, l_pad), jnp.float32),
        in_specs=[vmem, vmem, vmem],
        out_specs=vmem,
    )(p_t, w_hr, w2_t)

    # Strip zero border / tail and return in the module's NCHW convention.
    y = out[:, :l_valid].reshape(c_out, n, ho + 2, wo + 2)[:, :, 1:ho + 1, 1:wo + 1]
    return y.transpose(1, 0, 2, 3)                # (N, c_out, HO, WO)


# ------------------------------ ResidualBLock ------------------------------ #

class ResidualBlockPallas:
    """ResidualBLock(c_in, c_out, is_conv_block=True, change_c_mode='conv',
    downsample=True, activation=ReLU) with a concrete construct_mapping
    (conv3x3 stride-2 -> ReLU -> conv3x3); forward runs as ONE fused Pallas
    kernel."""
    # TODO(synk): construct_mapping is a user-supplied callable in the original
    # module; a representative two-conv mapping is instantiated here.  Only the
    # 4D conv branch (change_c_mode='conv', downsample=True) is implemented
    # (no 2D/Linear branch, no 'zeros' channel padding).

    def __init__(self, c_in, c_out, key):
        k_res, k_ds, k_f1, k_f2 = jax.random.split(key, 4)
        s = 0.1
        # self.residual = nn.Conv2d(c_in, c_out, kernel_size=1, bias=False)
        self.w_res = s * jax.random.normal(k_res, (c_out, c_in, 1, 1), jnp.float32)
        # self.downsampling = nn.Conv2d(c_out, c_out, 3, stride=2, padding=1, bias=False)
        self.w_ds = s * jax.random.normal(k_ds, (c_out, c_out, 3, 3), jnp.float32)
        # self.f = construct_mapping(c_in, c_out, downsample=True)
        self.w_f1 = s * jax.random.normal(k_f1, (c_out, c_in, 3, 3), jnp.float32)
        self.w_f2 = s * jax.random.normal(k_f2, (c_out, c_out, 3, 3), jnp.float32)

        # ---- one-time weight preprocessing (hoisted out of forward) ----
        # Fold the 1x1 residual conv into the stride-2 3x3 downsample conv so
        # the residual path reuses f's im2col patches and the SAME MXU pass.
        w_comb = jnp.einsum("ochw,ci->oihw", self.w_ds, self.w_res[:, :, 0, 0])
        self.w_hr = jnp.concatenate(
            [self.w_f1.reshape(c_out, -1),          # (c_out, c_in*9)  f path
             w_comb.reshape(c_out, -1)], axis=0)    # (c_out, c_in*9)  residual
        # Second conv taps as (9, c_out, c_out) matrices indexed [k, o, c].
        self.w2_t = self.w_f2.transpose(2, 3, 0, 1).reshape(9, c_out, c_out)

    def __call__(self, x):
        if x.ndim != 4:
            raise ValueError("Only 4D (NCHW) inputs supported in this instantiation.")
        # y = ReLU( conv(ReLU(conv_s2(x))) + conv_ds_s2(conv_1x1(x)) ), fully fused.
        return _resblock_forward(x, self.w_hr, self.w2_t)


# ------------------------------- reference --------------------------------- #

def _ref_conv(x, w, stride, pad):
    return lax.conv_general_dilated(
        x, w, (stride, stride), [(pad, pad), (pad, pad)],
        dimension_numbers=("NCHW", "OIHW", "NCHW"))


def _ref_forward(block, x):
    r = _ref_conv(x, block.w_res, 1, 0)
    r = _ref_conv(r, block.w_ds, 2, 1)
    h = jnp.maximum(_ref_conv(x, block.w_f1, 2, 1), 0.0)
    f = _ref_conv(h, block.w_f2, 1, 1)
    return jnp.maximum(f + r, 0.0)


if __name__ == "__main__":
    key = jax.random.PRNGKey(0)
    k_x, k_p = jax.random.split(key)
    x = jax.random.normal(k_x, (2, 4, 16, 16), jnp.float32)   # NCHW

    block = ResidualBlockPallas(c_in=4, c_out=8, key=k_p)
    y = jax.block_until_ready(block(x))

    assert y.shape == (2, 8, 8, 8), y.shape   # downsampled 16x16 -> 8x8
    y_ref = _ref_forward(block, x)
    err = float(jnp.max(jnp.abs(y - y_ref)))
    assert err < 1e-4, f"max abs error {err}"
    print("KERNEL_OK")
</pallas_src>

<mosaic_0001>
module attributes {stable_mosaic.version = 11 : i64} {
  func.func @kernel(%arg0: memref<36x256xf32, #tpu.memory_space<vmem>>, %arg1: memref<16x36xf32, #tpu.memory_space<vmem>>, %arg2: memref<9x8x8xf32, #tpu.memory_space<vmem>>, %arg3: memref<8x256xf32, #tpu.memory_space<vmem>>) attributes {dimension_semantics = [], scalar_prefetch = 0 : i64, scratch_operands = 0 : i64, tpu.core_type = #tpu.core_type<tc>} {
    %c0 = arith.constant 0 : index
    %c0_0 = arith.constant 0 : index
    %0 = vector.load %arg1[%c0, %c0_0] : memref<16x36xf32, #tpu.memory_space<vmem>>, vector<16x36xf32>
    %c0_1 = arith.constant 0 : index
    %c0_2 = arith.constant 0 : index
    %1 = vector.load %arg0[%c0_1, %c0_2] : memref<36x256xf32, #tpu.memory_space<vmem>>, vector<36x256xf32>
    %cst = arith.constant dense<0.000000e+00> : vector<16x256xf32>
    %2 = tpu.matmul %0, %1, %cst {dimension_numbers = #tpu.dot_dimension_numbers<[1], [0], [0], [1], [0, 0, 1, 1], [], []>} : vector<16x36xf32>, vector<36x256xf32>, vector<16x256xf32> -> vector<16x256xf32>
    %3 = vector.extract_strided_slice %2 {offsets = [0, 0], sizes = [8, 256], strides = [1, 1]} : vector<16x256xf32> to vector<8x256xf32>
    %cst_3 = arith.constant 0.000000e+00 : f32
    %4 = vector.broadcast %cst_3 : f32 to vector<8x256xf32>
    %5 = arith.maximumf %3, %4 : vector<8x256xf32>
    %6 = vector.extract_strided_slice %2 {offsets = [8, 0], sizes = [8, 256], strides = [1, 1]} : vector<16x256xf32> to vector<8x256xf32>
    %c11_i32 = arith.constant 11 : i32
    %7 = tpu.dynamic_rotate %5 by %c11_i32 dim 1 : vector<8x256xf32>, i32 -> vector<8x256xf32>
    %c0_4 = arith.constant 0 : index
    %c0_5 = arith.constant 0 : index
    %c0_6 = arith.constant 0 : index
    %8 = vector.load %arg2[%c0_4, %c0_5, %c0_6] : memref<9x8x8xf32, #tpu.memory_space<vmem>>, vector<1x8x8xf32>
    %9 = vector.shape_cast %8 : vector<1x8x8xf32> to vector<8x8xf32>
    %cst_7 = arith.constant dense<0.000000e+00> : vector<8x256xf32>
    %10 = tpu.matmul %9, %7, %cst_7 {dimension_numbers = #tpu.dot_dimension_numbers<[1], [0], [0], [1], [0, 0, 1, 1], [], []>} : vector<8x8xf32>, vector<8x256xf32>, vector<8x256xf32> -> vector<8x256xf32>
    %11 = arith.addf %6, %10 : vector<8x256xf32>
    %c10_i32 = arith.constant 10 : i32
    %12 = tpu.dynamic_rotate %5 by %c10_i32 dim 1 : vector<8x256xf32>, i32 -> vector<8x256xf32>
    %c1 = arith.constant 1 : index
    %c0_8 = arith.constant 0 : index
    %c0_9 = arith.constant 0 : index
    %13 = vector.load %arg2[%c1, %c0_8, %c0_9] : memref<9x8x8xf32, #tpu.memory_space<vmem>>, vector<1x8x8xf32>
    %14 = vector.shape_cast %13 : vector<1x8x8xf32> to vector<8x8xf32>
    %cst_10 = arith.constant dense<0.000000e+00> : vector<8x256xf32>
    %15 = tpu.matmul %14, %12, %cst_10 {dimension_numbers = #tpu.dot_dimension_numbers<[1], [0], [0], [1], [0, 0, 1, 1], [], []>} : vector<8x8xf32>, vector<8x256xf32>, vector<8x256xf32> -> vector<8x256xf32>
    %16 = arith.addf %11, %15 : vector<8x256xf32>
    %c9_i32 = arith.constant 9 : i32
    %17 = tpu.dynamic_rotate %5 by %c9_i32 dim 1 : vector<8x256xf32>, i32 -> vector<8x256xf32>
    %c2 = arith.constant 2 : index
    %c0_11 = arith.constant 0 : index
    %c0_12 = arith.constant 0 : index
    %18 = vector.load %arg2[%c2, %c0_11, %c0_12] : memref<9x8x8xf32, #tpu.memory_space<vmem>>, vector<1x8x8xf32>
    %19 = vector.shape_cast %18 : vector<1x8x8xf32> to vector<8x8xf32>
    %cst_13 = arith.constant dense<0.000000e+00> : vector<8x256xf32>
    %20 = tpu.matmul %19, %17, %cst_13 {dimension_numbers = #tpu.dot_dimension_numbers<[1], [0], [0], [1], [0, 0, 1, 1], [], []>} : vector<8x8xf32>, vector<8x256xf32>, vector<8x256xf32> -> vector<8x256xf32>
    %21 = arith.addf %16, %20 : vector<8x256xf32>
    %c1_i32 = arith.constant 1 : i32
    %22 = tpu.dynamic_rotate %5 by %c1_i32 dim 1 : vector<8x256xf32>, i32 -> vector<8x256xf32>
    %c3 = arith.constant 3 : index
    %c0_14 = arith.constant 0 : index
    %c0_15 = arith.constant 0 : index
    %23 = vector.load %arg2[%c3, %c0_14, %c0_15] : memref<9x8x8xf32, #tpu.memory_space<vmem>>, vector<1x8x8xf32>
    %24 = vector.shape_cast %23 : vector<1x8x8xf32> to vector<8x8xf32>
    %cst_16 = arith.constant dense<0.000000e+00> : vector<8x256xf32>
    %25 = tpu.matmul %24, %22, %cst_16 {dimension_numbers = #tpu.dot_dimension_numbers<[1], [0], [0], [1], [0, 0, 1, 1], [], []>} : vector<8x8xf32>, vector<8x256xf32>, vector<8x256xf32> -> vector<8x256xf32>
    %26 = arith.addf %21, %25 : vector<8x256xf32>
    %c4 = arith.constant 4 : index
    %c0_17 = arith.constant 0 : index
    %c0_18 = arith.constant 0 : index
    %27 = vector.load %arg2[%c4, %c0_17, %c0_18] : memref<9x8x8xf32, #tpu.memory_space<vmem>>, vector<1x8x8xf32>
    %28 = vector.shape_cast %27 : vector<1x8x8xf32> to vector<8x8xf32>
    %cst_19 = arith.constant dense<0.000000e+00> : vector<8x256xf32>
    %29 = tpu.matmul %28, %5, %cst_19 {dimension_numbers = #tpu.dot_dimension_numbers<[1], [0], [0], [1], [0, 0, 1, 1], [], []>} : vector<8x8xf32>, vector<8x256xf32>, vector<8x256xf32> -> vector<8x256xf32>
    %30 = arith.addf %26, %29 : vector<8x256xf32>
    %c255_i32 = arith.constant 255 : i32
    %31 = tpu.dynamic_rotate %5 by %c255_i32 dim 1 : vector<8x256xf32>, i32 -> vector<8x256xf32>
    %c5 = arith.constant 5 : index
    %c0_20 = arith.constant 0 : index
    %c0_21 = arith.constant 0 : index
    %32 = vector.load %arg2[%c5, %c0_20, %c0_21] : memref<9x8x8xf32, #tpu.memory_space<vmem>>, vector<1x8x8xf32>
    %33 = vector.shape_cast %32 : vector<1x8x8xf32> to vector<8x8xf32>
    %cst_22 = arith.constant dense<0.000000e+00> : vector<8x256xf32>
    %34 = tpu.matmul %33, %31, %cst_22 {dimension_numbers = #tpu.dot_dimension_numbers<[1], [0], [0], [1], [0, 0, 1, 1], [], []>} : vector<8x8xf32>, vector<8x256xf32>, vector<8x256xf32> -> vector<8x256xf32>
    %35 = arith.addf %30, %34 : vector<8x256xf32>
    %c247_i32 = arith.constant 247 : i32
    %36 = tpu.dynamic_rotate %5 by %c247_i32 dim 1 : vector<8x256xf32>, i32 -> vector<8x256xf32>
    %c6 = arith.constant 6 : index
    %c0_23 = arith.constant 0 : index
    %c0_24 = arith.constant 0 : index
    %37 = vector.load %arg2[%c6, %c0_23, %c0_24] : memref<9x8x8xf32, #tpu.memory_space<vmem>>, vector<1x8x8xf32>
    %38 = vector.shape_cast %37 : vector<1x8x8xf32> to vector<8x8xf32>
    %cst_25 = arith.constant dense<0.000000e+00> : vector<8x256xf32>
    %39 = tpu.matmul %38, %36, %cst_25 {dimension_numbers = #tpu.dot_dimension_numbers<[1], [0], [0], [1], [0, 0, 1, 1], [], []>} : vector<8x8xf32>, vector<8x256xf32>, vector<8x256xf32> -> vector<8x256xf32>
    %40 = arith.addf %35, %39 : vector<8x256xf32>
    %c246_i32 = arith.constant 246 : i32
    %41 = tpu.dynamic_rotate %5 by %c246_i32 dim 1 : vector<8x256xf32>, i32 -> vector<8x256xf32>
    %c7 = arith.constant 7 : index
    %c0_26 = arith.constant 0 : index
    %c0_27 = arith.constant 0 : index
    %42 = vector.load %arg2[%c7, %c0_26, %c0_27] : memref<9x8x8xf32, #tpu.memory_space<vmem>>, vector<1x8x8xf32>
    %43 = vector.shape_cast %42 : vector<1x8x8xf32> to vector<8x8xf32>
    %cst_28 = arith.constant dense<0.000000e+00> : vector<8x256xf32>
    %44 = tpu.matmul %43, %41, %cst_28 {dimension_numbers = #tpu.dot_dimension_numbers<[1], [0], [0], [1], [0, 0, 1, 1], [], []>} : vector<8x8xf32>, vector<8x256xf32>, vector<8x256xf32> -> vector<8x256xf32>
    %45 = arith.addf %40, %44 : vector<8x256xf32>
    %c245_i32 = arith.constant 245 : i32
    %46 = tpu.dynamic_rotate %5 by %c245_i32 dim 1 : vector<8x256xf32>, i32 -> vector<8x256xf32>
    %c8 = arith.constant 8 : index
    %c0_29 = arith.constant 0 : index
    %c0_30 = arith.constant 0 : index
    %47 = vector.load %arg2[%c8, %c0_29, %c0_30] : memref<9x8x8xf32, #tpu.memory_space<vmem>>, vector<1x8x8xf32>
    %48 = vector.shape_cast %47 : vector<1x8x8xf32> to vector<8x8xf32>
    %cst_31 = arith.constant dense<0.000000e+00> : vector<8x256xf32>
    %49 = tpu.matmul %48, %46, %cst_31 {dimension_numbers = #tpu.dot_dimension_numbers<[1], [0], [0], [1], [0, 0, 1, 1], [], []>} : vector<8x8xf32>, vector<8x256xf32>, vector<8x256xf32> -> vector<8x256xf32>
    %50 = arith.addf %45, %49 : vector<8x256xf32>
    %cst_32 = arith.constant 0.000000e+00 : f32
    %51 = vector.broadcast %cst_32 : f32 to vector<8x256xf32>
    %52 = arith.maximumf %50, %51 : vector<8x256xf32>
    %c0_33 = arith.constant 0 : index
    %c0_34 = arith.constant 0 : index
    %53 = vector.load %arg3[%c0_33, %c0_34] : memref<8x256xf32, #tpu.memory_space<vmem>>, vector<8x256xf32>
    tpu.vector_store %arg3[%c0_33, %c0_34], %52 {strides = array<i32>} : memref<8x256xf32, #tpu.memory_space<vmem>>, vector<8x256xf32>,
    return
  }
}

</mosaic_0001>

<bundles_post_ra>
// kernel: _resblock_forward.1
= control target key start
LH: loop header
LB: loop body
LE: loop exit
PB: predicated region body
PF: predicated region fallthrough
CT: control target
= control target key end

     0   :  { %v943_v3 = vmov 0.0   ;;  %vm33_vm0 = vcmask 1043456   ;;  %vm26_vm1 = vcmask 293888   ;;  %s944_s7 = smov 1   ;;  %s945_s8 = smov 9   ;;  %v123_v21 = vlaneseq  ;;  %s1079_s0 = inlined_call_operand.vmem [shape: f32[36,256], index: 0, kind: input, shape index: {}]   ;;  %s1080_s1 = inlined_call_operand.vmem [shape: f32[16,36], index: 1, kind: input, shape index: {}]   ;;  %s1081_s2 = inlined_call_operand.vmem [shape: f32[9,8,8], index: 2, kind: input, shape index: {}]   ;;  %s1082_s3 = inlined_call_operand.vmem [shape: f32[8,256], index: 3, kind: output, shape index: {}]  }
   0x1   :  { %v17_v0 = vld [vmem:[%s1079_s0 + $0x8] sm:$0xff]  ;;  %v19_v1 = vld [vmem:[%s1079_s0 + $0x18] sm:$0xff]  ;;  %v16_v2 = vld [vmem:[%s1079_s0] sm:$0xff]  ;;  %104 = vmatprep.mubr.f32.mxu1 %v943_v3  ;;  %367 = vmatprep.mubr.f32.mxu0 %v943_v3  ;;  %s946_s10 = smov 127   ;;  %s947_s11 = smov 119   ;;  %vm129_vm4 = vcmask 64512  }
   0x2   :  { %v908_v4 = vpack.c.bf16 %v19_v1, %v17_v0  ;;  %v18_v5 = vld [vmem:[%s1079_s0 + $0x10] sm:$0xff]  ;;  %v21_v6 = vld [vmem:[%s1079_s0 + $0x28] sm:$0xff]  ;;  %v23_v7 = vld [vmem:[%s1079_s0 + $0x38] sm:$0xff]  ;;  %s948_s12 = smov 11   ;;  %s949_s13 = smov 118   ;;  %v1012_v22 = vand.u32 127, %v123_v21 }
   0x3   :  { %v910_v8 = vpack.c.bf16 %v18_v5, %v16_v2  ;;  %v912_v9 = vpack.c.bf16 %v23_v7, %v21_v6  ;;  %v20_v10 = vld [vmem:[%s1079_s0 + $0x20] sm:$0xff]  ;;  %v22_v11 = vld [vmem:[%s1079_s0 + $0x30] sm:$0xff]  ;;  %v25_v13 = vld [vmem:[%s1079_s0 + $0x48] sm:$0xf]  ;;  %s950_s14 = smov 10   ;;  %s951_s15 = smov 117  }
   0x4   :  { %909 = vmatprep.subr.bf16.mxu1 %v908_v4  ;;  %v914_v12 = vpack.c.bf16 %v22_v11, %v20_v10  ;;  %v24_v14 = vld [vmem:[%s1079_s0 + $0x40] sm:$0xf]  ;;  %v15_v20 = vld [vmem:[%s1080_s1 + $0x8] sm:$0xff]  ;;  %vm295_vm2 = vcmp.lt.s32.totalorder %v1012_v22, 9  ;;  %vm380_vm3 = vcmp.lt.s32.totalorder %v1012_v22, 1  ;;  %v894_v29 = vld [vmem:[%s1081_s2 + $0x10] sm:$0xff] }
   0x5   :  { %911 = vmatpush1.bf16.msra.mxu1 %v910_v8  ;;  %v14_v15 = vld [vmem:[%s1080_s1] sm:$0xff]  ;;  %v896_v36 = vld [vmem:[%s1081_s2 + $0x18] sm:$0xff]  ;;  %vm543_vm5 = vcmp.lt.s32.totalorder %v1012_v22, 127  ;;  %vm125_vm6 = vcmp.lt.s32.totalorder %v1012_v22, 11  ;;  %vm628_vm7 = vcmp.lt.s32.totalorder %v1012_v22, 119  ;;  %vm210_vm8 = vcmp.lt.s32.totalorder %v1012_v22, 10 }
   0x6   :  { %913 = vmatprep.subr.bf16.mxu1 %v912_v9  ;;  %v128_v42 = vld [vmem:[%s1081_s2] sm:$0xff]  ;;  %v892_v52 = vld [vmem:[%s1081_s2 + $0x8] sm:$0xff]  ;;  %vm713_vm9 = vcmp.lt.s32.totalorder %v1012_v22, 118  ;;  %v902_v56 = vld [vmem:[%s1081_s2 + $0x30] sm:$0xff]  ;;  %vm798_vm10 = vcmp.lt.s32.totalorder %v1012_v22, 117 }
   0x7   :  { %v898_v45 = vld [vmem:[%s1081_s2 + $0x20] sm:$0xff]  ;;  %v900_v53 = vld [vmem:[%s1081_s2 + $0x28] sm:$0xff]  ;;  %v904_v61 = vld [vmem:[%s1081_s2 + $0x38] sm:$0xff] }
   0x8   :  { %v906_v63 = vld [vmem:[%s1081_s2 + $0x40] sm:$0xff] }
   0x9   :  { %915 = vmatpush1.bf16.msra.mxu1 %v914_v12 }
   0xa   :  { %887 = vmatprep.subr.msk.mxu1 %vm33_vm0, %v25_v13 }
   0xd   :  { %888 = vmatpush1.msk.msra.mxu1 %vm33_vm0, %v24_v14 }
   0xe   :  { %889 = vmatmul.mubr.msk.f32.vlgmr.msra.gmra.mrb[0].mxu1 %vm26_vm1, %v14_v15 }
   0xf   :  { %110 = vmatprep.mubr.f32.mxu1 %v943_v3 }
  0x12   :  { %890 = vmatmul.mubr.msk.f32.gmra.mrb[2].mxu1 %vm26_vm1, %v15_v20 }
  0x13   :  { %197 = vmatprep.mubr.f32.mxu1 %v943_v3 }
  0xe1   :  { %v106_v16 = vpop.f32.mrb[0].mxu1 }
  0xe2   :  { %v117_v17 = vmax.f32 %v106_v16, 0.0  ;;  %v108_v18 = vpop.f32.mrb[1].mxu1 }
  0xe3   :  { %v118_v19 = vmax.f32 %v108_v18, 0.0 }
  0xe4   :  { %376 = vrot.lane.b32.xlu1 %v117_v17, %s944_s7  ;;  %291 = vrot.lane.b32.xlu0 %v117_v17, %s945_s8 }
  0xe8   :  { %378 = vrot.lane.b32.xlu1 %v118_v19, %s944_s7  ;;  %293 = vrot.lane.b32.xlu0 %v118_v19, %s945_s8 }
  0xec   :  { %541 = vrot.lane.b32.xlu1 %v118_v19, %s946_s10  ;;  %539 = vrot.lane.b32.xlu0 %v117_v17, %s946_s10 }
  0xf0   :  { %626 = vrot.lane.b32.xlu1 %v118_v19, %s947_s11  ;;  %624 = vrot.lane.b32.xlu0 %v117_v17, %s947_s11 }
  0xf4   :  { %121 = vrot.lane.b32.xlu1 %v118_v19, %s948_s12  ;;  %119 = vrot.lane.b32.xlu0 %v117_v17, %s948_s12 }
  0xf8   :  { %711 = vrot.lane.b32.xlu1 %v118_v19, %s949_s13  ;;  %709 = vrot.lane.b32.xlu0 %v117_v17, %s949_s13 }
  0xfc   :  { %208 = vrot.lane.b32.xlu1 %v118_v19, %s950_s14  ;;  %206 = vrot.lane.b32.xlu0 %v117_v17, %s950_s14 }
 0x100   :  { %796 = vrot.lane.b32.xlu1 %v118_v19, %s951_s15  ;;  %794 = vrot.lane.b32.xlu0 %v117_v17, %s951_s15 }
 0x156   :  { %v377_v23 = vpop.permute.xlu1 %376  ;;  %v292_v24 = vpop.permute.xlu0 %291 }
 0x15a   :  { %v379_v25 = vpop.permute.xlu1 %378  ;;  %v294_v26 = vpop.permute.xlu0 %293 }
 0x15b   :  { %v296_v27 = vsel %vm295_vm2, %v292_v24, %v294_v26  ;;  %v297_v28 = vsel %vm295_vm2, %v294_v26, %v292_v24  ;;  %v381_v30 = vsel %vm380_vm3, %v377_v23, %v379_v25  ;;  %v382_v31 = vsel %vm380_vm3, %v379_v25, %v377_v23 }
 0x15c   :  { %303 = vmatprep.subr.mxu0 %v296_v27 }
 0x15d   :  { %304 = vmatpush1.msra.mxu0 %v297_v28 }
 0x15e   :  { %v542_v32 = vpop.permute.xlu1 %541  ;;  %895 = vmatmul.mubr.msk.f32.vlgmr.msra.gmra.mrb[0].mxu0 %vm129_vm4, %v894_v29  ;;  %388 = vmatprep.subr.mxu0 %v381_v30  ;;  %v540_v33 = vpop.permute.xlu0 %539 }
 0x15f   :  { %389 = vmatpush1.msra.mxu0 %v382_v31  ;;  %452 = vmatprep.mubr.f32.mxu0 %v943_v3  ;;  %v545_v40 = vsel %vm543_vm5, %v542_v32, %v540_v33  ;;  %v544_v46 = vsel %vm543_vm5, %v540_v33, %v542_v32 }
 0x160   :  { %466 = vmatprep.subr.mxu0 %v118_v19 }
 0x162   :  { %v627_v34 = vpop.permute.xlu1 %626  ;;  %v625_v35 = vpop.permute.xlu0 %624 }
 0x163   :  { %v630_v50 = vsel %vm628_vm7, %v627_v34, %v625_v35  ;;  %v629_v54 = vsel %vm628_vm7, %v625_v35, %v627_v34 }
 0x166   :  { %v122_v37 = vpop.permute.xlu1 %121  ;;  %897 = vmatmul.mubr.msk.f32.vlgmr.msra.gmra.mrb[0].mxu0 %vm129_vm4, %v896_v36  ;;  %v120_v38 = vpop.permute.xlu0 %119 }
 0x167   :  { %467 = vmatpush1.msra.mxu0 %v117_v17  ;;  %v127_v39 = vsel %vm125_vm6, %v122_v37, %v120_v38  ;;  %v126_v41 = vsel %vm125_vm6, %v120_v38, %v122_v37  ;;  %530 = vmatprep.mubr.f32.mxu0 %v943_v3 }
 0x168   :  { %551 = vmatprep.subr.mxu0 %v545_v40  ;;  %133 = vmatprep.subr.mxu1 %v126_v41 }
 0x169   :  { %134 = vmatpush1.msra.mxu1 %v127_v39 }
 0x16a   :  { %v712_v43 = vpop.permute.xlu1 %711  ;;  %v710_v44 = vpop.permute.xlu0 %709  ;;  %891 = vmatmul.mubr.msk.f32.vlgmr.msra.gmra.mrb[2].mxu1 %vm129_vm4, %v128_v42 }
 0x16b   :  { %282 = vmatprep.mubr.f32.mxu1 %v943_v3  ;;  %v715_v55 = vsel %vm713_vm9, %v712_v43, %v710_v44  ;;  %v714_v59 = vsel %vm713_vm9, %v710_v44, %v712_v43 }
 0x16e   :  { %v209_v47 = vpop.permute.xlu1 %208  ;;  %899 = vmatmul.mubr.msk.f32.vlgmr.msra.gmra.mrb[0].mxu0 %vm129_vm4, %v898_v45  ;;  %v207_v48 = vpop.permute.xlu0 %206 }
 0x16f   :  { %552 = vmatpush1.msra.mxu0 %v544_v46  ;;  %v212_v49 = vsel %vm210_vm8, %v209_v47, %v207_v48  ;;  %v211_v51 = vsel %vm210_vm8, %v207_v48, %v209_v47  ;;  %615 = vmatprep.mubr.f32.mxu0 %v943_v3 }
 0x170   :  { %636 = vmatprep.subr.mxu0 %v630_v50  ;;  %218 = vmatprep.subr.mxu1 %v211_v51 }
 0x171   :  { %219 = vmatpush1.msra.mxu1 %v212_v49 }
 0x172   :  { %893 = vmatmul.mubr.msk.f32.vlgmr.msra.gmra.mrb[2].mxu1 %vm129_vm4, %v892_v52  ;;  %v797_v57 = vpop.permute.xlu1 %796  ;;  %v795_v58 = vpop.permute.xlu0 %794 }
 0x173   :  { %v800_v60 = vsel %vm798_vm10, %v797_v57, %v795_v58  ;;  %v799_v62 = vsel %vm798_vm10, %v795_v58, %v797_v57 }
 0x176   :  { %901 = vmatmul.mubr.msk.f32.vlgmr.msra.gmra.mrb[0].mxu0 %vm129_vm4, %v900_v53 }
 0x177   :  { %637 = vmatpush1.msra.mxu0 %v629_v54  ;;  %700 = vmatprep.mubr.f32.mxu0 %v943_v3 }
 0x178   :  { %721 = vmatprep.subr.mxu0 %v715_v55 }
 0x17e   :  { %903 = vmatmul.mubr.msk.f32.vlgmr.msra.gmra.mrb[0].mxu0 %vm129_vm4, %v902_v56 }
 0x17f   :  { %722 = vmatpush1.msra.mxu0 %v714_v59  ;;  %785 = vmatprep.mubr.f32.mxu0 %v943_v3 }
 0x180   :  { %806 = vmatprep.subr.mxu0 %v800_v60 }
 0x186   :  { %905 = vmatmul.mubr.msk.f32.vlgmr.msra.gmra.mrb[0].mxu0 %vm129_vm4, %v904_v61 }
 0x187   :  { %807 = vmatpush1.msra.mxu0 %v799_v62  ;;  %870 = vmatprep.mubr.f32.mxu0 %v943_v3 }
 0x18e   :  { %907 = vmatmul.mubr.msk.f32.vlgmr.msra.gmra.mrb[0].mxu0 %vm129_vm4, %v906_v63 }
 0x245   :  { %v284_v0 = vpop.f32.mrb[2].mxu1 }
 0x246   :  { %v286_v1 = vpop.f32.mrb[3].mxu1 }
 0x261   :  { %v872_v2 = vpop.f32.mrb[0].mxu0 }
 0x262   :  { %v916_v4 = vadd.f32 %v872_v2, %v284_v0  ;;  %v874_v5 = vpop.f32.mrb[1].mxu0 }
 0x263   :  { %v917_v6 = vadd.f32 %v874_v5, %v286_v1 }
 0x264   :  { %v879_v7 = vmax.f32 %v916_v4, 0.0 }
 0x265   :  { %v880_v8 = vmax.f32 %v917_v6, 0.0 }
 0x266   :  { %881 = vst [vmem:[%s1082_s3] sm:$0xff] %v879_v7 }
 0x267   :  { %882 = vst [vmem:[%s1082_s3 + $0x8] sm:$0xff] %v880_v8 }

</bundles_post_ra>
